<compile_context>
chip_gen: v5e
topology: v5e:2x2
jax: 0.10.0
libtpu: 0.0.40
codegen_flags: <defaults>
</compile_context>

<pallas_src>
import functools

import jax
import jax.numpy as jnp
from jax import lax
from jax.experimental import pallas as pl
from jax.experimental.pallas import tpu as pltpu

_SCALE_X = 8.0 * 1.5   # 12.0
_SCALE_Y = 5.0 * 1.5   # 7.5
_PD_EPS = 1e-6         # F.pairwise_distance default eps (added to the diff)
_LANES = 128


def _myloss2_ref(pred, pos, dmin):
    """Pure-JAX reference mirroring the PyTorch forward (also the small-N path)."""
    pred = jnp.asarray(pred, jnp.float32)
    pos = jnp.asarray(pos, jnp.float32).reshape(1, 2)
    scale = jnp.array([_SCALE_X, _SCALE_Y], jnp.float32)
    diff = pred * scale - pos * scale + _PD_EPS
    temp = jnp.sqrt(jnp.sum(diff * diff, axis=1))
    n = jnp.maximum(dmin - temp, 0.0)
    return jnp.sum(n) / (jnp.count_nonzero(n) + 0.01)


def _myloss2_kernel(params_ref, x_ref, y_ref, psum_ref, pcnt_ref, *,
                    n_valid, block_rows, steps_per_split):
    c = pl.program_id(0)          # which split of N (one per TensorCore on v7x)
    i = pl.program_id(1)          # step along N inside this split (reduction axis)

    # Zero this split's per-lane accumulators on its first step.
    @pl.when(i == 0)
    def _init():
        psum_ref[...] = jnp.zeros_like(psum_ref)
        pcnt_ref[...] = jnp.zeros_like(pcnt_ref)

    cx = params_ref[0]            # 12.0 * pos_x - eps
    cy = params_ref[1]            # 7.5 * pos_y - eps
    dmin = params_ref[2]

    # Full-width VPU math; sqrt goes to the EUP.  No XLU work in the hot loop.
    dx = x_ref[...] * _SCALE_X - cx
    dy = y_ref[...] * _SCALE_Y - cy
    dist = jnp.sqrt(dx * dx + dy * dy)
    n = jnp.maximum(dmin - dist, 0.0)

    # Mask padded tail elements out of BOTH the sum and the nonzero count.
    r = lax.broadcasted_iota(jnp.int32, n.shape, 0)
    l = lax.broadcasted_iota(jnp.int32, n.shape, 1)
    base = (c * steps_per_split + i) * (block_rows * _LANES)
    gidx = base + r * _LANES + l
    n = jnp.where(gidx < n_valid, n, 0.0)

    # Per-lane partial accumulation into the resident output blocks.
    psum_ref[...] += n
    pcnt_ref[...] += (n > 0.0).astype(jnp.float32)


def myloss2(pred, pos, dmin, *, block_rows=512, num_splits=2,
            small_n_threshold=1024):
    """pred: (N, 2), pos: (2,) or (1, 2), dmin: scalar. Returns scalar f32 loss."""
    pred = jnp.asarray(pred, jnp.float32)
    pos = jnp.asarray(pos, jnp.float32).reshape(2)
    dmin = jnp.asarray(dmin, jnp.float32)
    N = int(pred.shape[0])

    # Tiny problems are launch-overhead bound: use fused XLA instead.
    if N <= small_n_threshold:
        return _myloss2_ref(pred, pos, dmin)

    # Tile geometry: block_rows x 128 elements per grid step, N split across
    # `num_splits` independent ranges.
    rows_needed = -(-N // _LANES)
    rows_rounded = -(-rows_needed // 8) * 8
    br = max(8, (min(block_rows, rows_rounded) // 8) * 8)
    chunk = br * num_splits
    total_rows = -(-rows_needed // chunk) * chunk
    steps_per_split = total_rows // chunk

    pad = total_rows * _LANES - N
    xcol = jnp.pad(pred[:, 0], (0, pad)).reshape(total_rows, _LANES)
    ycol = jnp.pad(pred[:, 1], (0, pad)).reshape(total_rows, _LANES)

    # Fold pos * scale and the pairwise-distance eps into two scalars (SMEM).
    params = jnp.stack([pos[0] * _SCALE_X - _PD_EPS,
                        pos[1] * _SCALE_Y - _PD_EPS,
                        dmin]).astype(jnp.float32)

    kernel = functools.partial(_myloss2_kernel, n_valid=N, block_rows=br,
                               steps_per_split=steps_per_split)

    def in_map(c, i):
        return (c * steps_per_split + i, 0)

    psum, pcnt = pl.pallas_call(
        kernel,
        grid=(num_splits, steps_per_split),
        in_specs=[
            pl.BlockSpec(memory_space=pltpu.MemorySpace.SMEM),   # params (3,)
            pl.BlockSpec((br, _LANES), in_map),                  # x column slab
            pl.BlockSpec((br, _LANES), in_map),                  # y column slab
        ],
        out_specs=(
            pl.BlockSpec((br, _LANES), lambda c, i: (c, 0)),     # per-lane sums
            pl.BlockSpec((br, _LANES), lambda c, i: (c, 0)),     # per-lane counts
        ),
        out_shape=(
            jax.ShapeDtypeStruct((num_splits * br, _LANES), jnp.float32),
            jax.ShapeDtypeStruct((num_splits * br, _LANES), jnp.float32),
        ),
        compiler_params=pltpu.CompilerParams(
            dimension_semantics=("parallel", "arbitrary")),
    )(params, xcol, ycol)

    # Single cross-lane reduce + the (cnt + 0.01) divide, done once outside.
    return jnp.sum(psum) / (jnp.sum(pcnt) + 0.01)


if __name__ == "__main__":
    key = jax.random.PRNGKey(0)
    k1, k2 = jax.random.split(key)

    N = 10000                                            # batch of 2-D predictions
    pred = jax.random.uniform(k1, (N, 2), jnp.float32)   # (N, 2)
    pos = jax.random.uniform(k2, (2,), jnp.float32)      # target position
    dmin = 6.0                                           # min-distance threshold

    # Small block_rows so the test exercises a multi-step (2 x 3) grid,
    # accumulator init, and tail masking; default block_rows=512 for real sizes.
    loss = myloss2(pred, pos, dmin, block_rows=16)
    jax.block_until_ready(loss)

    ref = _myloss2_ref(pred, pos, dmin)
    assert jnp.allclose(loss, ref, rtol=1e-4, atol=1e-4), (loss, ref)

    print("KERNEL_OK")
</pallas_src>

<mosaic_0001>
module attributes {stable_mosaic.version = 11 : i64} {
  func.func @_myloss2_kernel(%arg0: i32, %arg1: i32, %arg2: memref<3xf32, #tpu.memory_space<smem>>, %arg3: memref<16x128xf32, #tpu.memory_space<vmem>>, %arg4: memref<16x128xf32, #tpu.memory_space<vmem>>, %arg5: memref<16x128xf32, #tpu.memory_space<vmem>>, %arg6: memref<16x128xf32, #tpu.memory_space<vmem>>) attributes {dimension_semantics = [#tpu.dimension_semantics<parallel>, #tpu.dimension_semantics<arbitrary>], iteration_bounds = array<i64: 2, 3>, scalar_prefetch = 0 : i64, scratch_operands = 0 : i64, tpu.core_type = #tpu.core_type<tc>, window_params = [{transform_indices = @transform_0, window_bounds = array<i64: 3>}, {transform_indices = @transform_1, window_bounds = array<i64: 16, 128>}, {transform_indices = @transform_2, window_bounds = array<i64: 16, 128>}, {transform_indices = @transform_3, window_bounds = array<i64: 16, 128>}, {transform_indices = @transform_4, window_bounds = array<i64: 16, 128>}]} {
    %c0_i32 = arith.constant 0 : i32
    %0 = arith.cmpi eq, %arg1, %c0_i32 : i32
    %1 = arith.extui %0 : i1 to i32
    %c0_i32_0 = arith.constant 0 : i32
    %2 = arith.cmpi ne, %1, %c0_i32_0 : i32
    scf.if %2 {
      %cst_17 = arith.constant 0.000000e+00 : f32
      %48 = vector.broadcast %cst_17 : f32 to vector<16x128xf32>
      %c0_18 = arith.constant 0 : index
      %c0_19 = arith.constant 0 : index
      %49 = vector.load %arg5[%c0_18, %c0_19] : memref<16x128xf32, #tpu.memory_space<vmem>>, vector<16x128xf32>
      tpu.vector_store %arg5[%c0_18, %c0_19], %48 {strides = array<i32>} : memref<16x128xf32, #tpu.memory_space<vmem>>, vector<16x128xf32>,
      %cst_20 = arith.constant 0.000000e+00 : f32
      %50 = vector.broadcast %cst_20 : f32 to vector<16x128xf32>
      %c0_21 = arith.constant 0 : index
      %c0_22 = arith.constant 0 : index
      %51 = vector.load %arg6[%c0_21, %c0_22] : memref<16x128xf32, #tpu.memory_space<vmem>>, vector<16x128xf32>
      tpu.vector_store %arg6[%c0_21, %c0_22], %50 {strides = array<i32>} : memref<16x128xf32, #tpu.memory_space<vmem>>, vector<16x128xf32>,
    } else {
    }
    %c0 = arith.constant 0 : index
    %3 = memref.load %arg2[%c0] : memref<3xf32, #tpu.memory_space<smem>>
    %c1 = arith.constant 1 : index
    %4 = memref.load %arg2[%c1] : memref<3xf32, #tpu.memory_space<smem>>
    %c2 = arith.constant 2 : index
    %5 = memref.load %arg2[%c2] : memref<3xf32, #tpu.memory_space<smem>>
    %c0_1 = arith.constant 0 : index
    %c0_2 = arith.constant 0 : index
    %6 = vector.load %arg3[%c0_1, %c0_2] : memref<16x128xf32, #tpu.memory_space<vmem>>, vector<16x128xf32>
    %cst = arith.constant 1.200000e+01 : f32
    %7 = vector.broadcast %cst : f32 to vector<16x128xf32>
    %8 = arith.mulf %6, %7 : vector<16x128xf32>
    %9 = vector.broadcast %3 : f32 to vector<16x128xf32>
    %10 = arith.subf %8, %9 : vector<16x128xf32>
    %c0_3 = arith.constant 0 : index
    %c0_4 = arith.constant 0 : index
    %11 = vector.load %arg4[%c0_3, %c0_4] : memref<16x128xf32, #tpu.memory_space<vmem>>, vector<16x128xf32>
    %cst_5 = arith.constant 7.500000e+00 : f32
    %12 = vector.broadcast %cst_5 : f32 to vector<16x128xf32>
    %13 = arith.mulf %11, %12 : vector<16x128xf32>
    %14 = vector.broadcast %4 : f32 to vector<16x128xf32>
    %15 = arith.subf %13, %14 : vector<16x128xf32>
    %16 = arith.mulf %10, %10 : vector<16x128xf32>
    %17 = arith.mulf %15, %15 : vector<16x128xf32>
    %18 = arith.addf %16, %17 : vector<16x128xf32>
    %19 = math.sqrt %18 : vector<16x128xf32>
    %20 = vector.broadcast %5 : f32 to vector<16x128xf32>
    %21 = arith.subf %20, %19 : vector<16x128xf32>
    %cst_6 = arith.constant 0.000000e+00 : f32
    %22 = vector.broadcast %cst_6 : f32 to vector<16x128xf32>
    %23 = arith.maximumf %21, %22 : vector<16x128xf32>
    %24 = tpu.iota {dimensions = array<i32: 0>} : vector<16x128xi32>
    %25 = tpu.iota {dimensions = array<i32: 1>} : vector<16x128xi32>
    %c3_i32 = arith.constant 3 : i32
    %26 = arith.muli %arg0, %c3_i32 : i32
    %27 = arith.addi %26, %arg1 : i32
    %c2048_i32 = arith.constant 2048 : i32
    %28 = arith.muli %27, %c2048_i32 : i32
    %c128_i32 = arith.constant 128 : i32
    %29 = vector.broadcast %c128_i32 : i32 to vector<16x128xi32>
    %30 = arith.muli %24, %29 : vector<16x128xi32>
    %31 = vector.broadcast %28 : i32 to vector<16x128xi32>
    %32 = arith.addi %31, %30 : vector<16x128xi32>
    %33 = arith.addi %32, %25 : vector<16x128xi32>
    %c10000_i32 = arith.constant 10000 : i32
    %34 = vector.broadcast %c10000_i32 : i32 to vector<16x128xi32>
    %35 = arith.cmpi slt, %33, %34 : vector<16x128xi32>
    %cst_7 = arith.constant 0.000000e+00 : f32
    %36 = vector.broadcast %cst_7 : f32 to vector<16x128xf32>
    %37 = arith.select %35, %23, %36 : vector<16x128xi1>, vector<16x128xf32>
    %c0_8 = arith.constant 0 : index
    %c0_9 = arith.constant 0 : index
    %38 = vector.load %arg5[%c0_8, %c0_9] : memref<16x128xf32, #tpu.memory_space<vmem>>, vector<16x128xf32>
    %39 = arith.addf %38, %37 : vector<16x128xf32>
    %c0_10 = arith.constant 0 : index
    %c0_11 = arith.constant 0 : index
    %40 = vector.load %arg5[%c0_10, %c0_11] : memref<16x128xf32, #tpu.memory_space<vmem>>, vector<16x128xf32>
    tpu.vector_store %arg5[%c0_10, %c0_11], %39 {strides = array<i32>} : memref<16x128xf32, #tpu.memory_space<vmem>>, vector<16x128xf32>,
    %c0_12 = arith.constant 0 : index
    %c0_13 = arith.constant 0 : index
    %41 = vector.load %arg6[%c0_12, %c0_13] : memref<16x128xf32, #tpu.memory_space<vmem>>, vector<16x128xf32>
    %cst_14 = arith.constant 0.000000e+00 : f32
    %42 = vector.broadcast %cst_14 : f32 to vector<16x128xf32>
    %43 = arith.cmpf ogt, %37, %42 : vector<16x128xf32>
    %44 = arith.extui %43 : vector<16x128xi1> to vector<16x128xi32>
    %45 = arith.sitofp %44 : vector<16x128xi32> to vector<16x128xf32>
    %46 = arith.addf %41, %45 : vector<16x128xf32>
    %c0_15 = arith.constant 0 : index
    %c0_16 = arith.constant 0 : index
    %47 = vector.load %arg6[%c0_15, %c0_16] : memref<16x128xf32, #tpu.memory_space<vmem>>, vector<16x128xf32>
    tpu.vector_store %arg6[%c0_15, %c0_16], %46 {strides = array<i32>} : memref<16x128xf32, #tpu.memory_space<vmem>>, vector<16x128xf32>,
    return
  }
  func.func @transform_0(%arg0: i32, %arg1: i32) -> i32 {
    %c0_i32 = arith.constant 0 : i32
    %c0_i32_0 = arith.constant 0 : i32
    return %c0_i32 : i32
  }
  func.func @transform_1(%arg0: i32, %arg1: i32) -> (i32, i32) {
    %c3_i32 = arith.constant 3 : i32
    %0 = arith.muli %arg0, %c3_i32 : i32
    %1 = arith.addi %0, %arg1 : i32
    %c0_i32 = arith.constant 0 : i32
    %c0_i32_0 = arith.constant 0 : i32
    return %1, %c0_i32 : i32, i32
  }
  func.func @transform_2(%arg0: i32, %arg1: i32) -> (i32, i32) {
    %c3_i32 = arith.constant 3 : i32
    %0 = arith.muli %arg0, %c3_i32 : i32
    %1 = arith.addi %0, %arg1 : i32
    %c0_i32 = arith.constant 0 : i32
    %c0_i32_0 = arith.constant 0 : i32
    return %1, %c0_i32 : i32, i32
  }
  func.func @transform_3(%arg0: i32, %arg1: i32) -> (i32, i32) {
    %c0_i32 = arith.constant 0 : i32
    %c0_i32_0 = arith.constant 0 : i32
    return %arg0, %c0_i32 : i32, i32
  }
  func.func @transform_4(%arg0: i32, %arg1: i32) -> (i32, i32) {
    %c0_i32 = arith.constant 0 : i32
    %c0_i32_0 = arith.constant 0 : i32
    return %arg0, %c0_i32 : i32, i32
  }
}

</mosaic_0001>

<bundles_post_ra>
// kernel: tpu_custom_call.1
= control target key start
LH: loop header
LB: loop body
LE: loop exit
PB: predicated region body
PF: predicated region fallthrough
CT: control target
= control target key end

     0   :  { %s1310_s0 = inlined_call_operand.hbm [shape: f32[3], index: 0, kind: input, shape index: {}]   ;;  %s1311_s1 = inlined_call_operand.hbm [shape: f32[96,128], index: 1, kind: input, shape index: {}]   ;;  %s1312_s2 = inlined_call_operand.hbm [shape: f32[96,128], index: 2, kind: input, shape index: {}]   ;;  %s1313_s3 = inlined_call_operand.hbm [shape: f32[32,128], index: 3, kind: output, shape index: {0}]   ;;  %s1314_s4 = inlined_call_operand.hbm [shape: f32[32,128], index: 4, kind: output, shape index: {1}]  }
   0x1   :  { %1325 = sst [smem:[#allocation24_spill]] %s1310_s0 }
   0x2   :  { %1326 = sst [smem:[#allocation25_spill]] %s1311_s1 }
   0x3   :  { %1327 = sst [smem:[#allocation26_spill]] %s1313_s3 }
   0x4   :  { %1328 = sst [smem:[#allocation27_spill]] %s1314_s4 }
   0x5   :  { %10 = vsyncpa [#allocation5], 0 }
   0x6   :  { %11 = vsyncpa [#allocation3], 0 }
   0x7   :  { %13 = vsyncpa [#allocation3 + $0x1], 0 }
   0x8   :  { %14 = vsyncpa [#allocation8], 0 }
   0x9   :  { %16 = vsyncpa [#allocation8 + $0x1], 0 }
   0xa   :  { %17 = vsyncpa [#allocation4], 0 }
   0xb   :  { %19 = vsyncpa [#allocation4 + $0x1], 0 }
   0xc   :  { %20 = vsyncpa [#allocation11], 0 }
   0xd   :  { %22 = vsyncpa [#allocation11 + $0x1], 0  ;;  %s1047_s15 = smov 0   ;;  %s1049_s16 = smov 0  }
   0xe   :  { %s1051_s17 = smov 0   ;;  %s1053_s18 = smov 0  }
   0xf   :  { %s1055_s19 = smov 0   ;;  %s1057_s20 = smov 0  }
  0x10   :  { %s1059_s21 = smov 0   ;;  %s1061_s22 = smov 0  }
  0x11   :  { %s1063_s23 = smov 0   ;;  %s1065_s24 = smov 0  }
  0x12   :  { %s1067_s25 = smov 0  }
  0x13 LB: > { %1329 = sst [smem:[#allocation17_spill]] %s973_s15  ;;  %s608_s26 = sadd.s32 4294967295, %s1013_s25   ;;  %s1013_s25 = sphi %s1067_s25, %s28_s25   ;;  %s1009_s24 = sphi %s1065_s24, %s1365_s24   ;;  %s1005_s23 = sphi %s1063_s23, %s1364_s23   ;;  %s1001_s22 = sphi %s1061_s22, %s1363_s22   ;;  %s997_s21 = sphi %s1059_s21, %s1355_s21   ;;  %s993_s20 = sphi %s1057_s20, %s1362_s20   ;;  %s989_s19 = sphi %s1055_s19, %s1361_s19   ;;  %s985_s18 = sphi %s1053_s18, %s1360_s18   ;;  %s981_s17 = sphi %s1051_s17, %s1359_s17   ;;  %s977_s16 = sphi %s1049_s16, %s1358_s16   ;;  %s973_s15 = sphi %s1047_s15, %s1357_s15  }
  0x14   : > { %1330 = sst [smem:[#allocation18_spill]] %s997_s21  ;;  %s609_s27 = sadd.s32 4294967294, %s1013_s25  }
  0x15   : > { %1331 = sst [smem:[#allocation19_spill]] %s1001_s22  ;;  %p79_p0 = scmp.ne.s32.totalorder %s993_s20, %s989_s19 }
  0x16   : > { %1332 = sst [smem:[#allocation20_spill]] %s1005_s23  ;;  %p80_p1 = scmp.eq.s32.totalorder %s1013_s25, 0 }
  0x17   : > { %1333 = sst [smem:[#allocation21_spill]] %s1013_s25  ;;  %p85_p2 = scmp.ne.s32.totalorder %s989_s19, %s985_s18 }
  0x18   : > { %p1106_p3 = scmp.eq.s32.totalorder %s608_s26, 0  ;;  %p1110_p4 = por %p80_p1, %p79_p0 }
  0x19   : > { %p138_p6 = scmp.ne.s32.totalorder %s981_s17, %s977_s16  ;;  %p139_p7 = scmp.eq.s32.totalorder %s608_s26, 5 }
  0x1a   : > { %p1117_p5 = por %p1106_p3, %p85_p2  ;;  %p144_p8 = scmp.ne.s32.totalorder %s977_s16, %s973_s15 }
  0x1b   : > { %p145_p9 = scmp.eq.s32.totalorder %s609_s27, 5  ;;  %p610_p10 = scmp.ge.s32.totalorder %s1013_s25, 1 }
  0x1c   : > { %p1126_p11 = por %p139_p7, %p138_p6  ;;  %p178_p12 = scmp.lt.s32.totalorder %s1013_s25, 7 }
  0x1d   : > { %p1131_p13 = por %p145_p9, %p144_p8  ;;  %s1342_s0 = sld [smem:[#allocation24_spill]] }
  0x1e   : > { %s1337_s6 = scalar_select %p1126_p11, 1, 0 }
  0x1f   : > { %s1339_s7 = scalar_select %p1131_p13, 1, 0 }
  0x20   : > { %1338 = sst [smem:[#allocation22_spill]] %s1337_s6  ;;  %p1135_p0 = pnand %p610_p10, %p178_p12 }
  0x21   : > { %1340 = sst [smem:[#allocation23_spill]] %s1339_s7  ;;  %p674_p2 = scmp.lt.s32.totalorder %s1013_s25, 6 }
  0x22   : > { %p655_p1 = pneg %p1135_p0  ;;  %s1015_s13 = smov [#allocation2]  }
  0x23   : > { %s190_s11 = sshll.u32 %s1342_s0, 4  ;;  %p1149_p7 = pnand %p674_p2, %p1110_p4  ;;  %s191_s11 = int_to_ptr.hbm [resolvable:$true] %s190_s11 }
  0x24   : > { %p656_p6 = pnand %p655_p1, %p1106_p3  ;;  %s37_s14 = sadd.s32 1, %s1005_s23 }
  0x25   : > { %p38_p8 = scmp.ge.s32.totalorder %s37_s14, 3  ;;  %s40_s18 = sadd.s32 1, %s1009_s24 }
  0x26   : > { %658 = dma.hbm_to_smem (!%p656_p6), %s191_s11, 16, %s1015_s13, [#allocation5]  }
  0x27   : > { %s65_s26 = smul.u32 3, %s1009_s24  ;;  %s72_s27 = sadd.s32 1, %s993_s20 }
  0x28   : > { %s1367_s14 = smov (%p38_p8, %s37_s14), 0  ;;  %s1369_s18 = smov (!%p38_p8, %s40_s18), %s1009_s24 }
  0x29   : > { %s66_s9 = sadd.s32 %s1005_s23, %s65_s26  ;;  %s1162_s10 = sand.u32 1, %s993_s20  }
  0x2a   : > { %p42_p4 = scmp.ge.s32.totalorder %s1369_s18, 2  ;;  %s613_s29 = sshll.u32 %s1162_s10, 4 }
  0x2b   : > { %s639_s11 = sshll.u32 %s66_s9, 4  ;;  %s1344_s1 = sld [smem:[#allocation25_spill]] }
  0x2c   : > { %s1371_s18 = smov (%p42_p4, %s1369_s18), 0  ;;  %s205_s6 = scalar_lea.vmem [#allocation6], %s613_s29 }
  0x2d   : > { %s67_s7 = smul.u32 3, %s1371_s18  ;;  %s125_s26 = ssub.s32 %s1009_s24, %s1371_s18 }
  0x2e   : > { %p126_p9 = scmp.eq.s32.totalorder %s125_s26, 0  ;;  %s215_s4 = sshll.u32 %s205_s6, 4  ;;  %s216_s4 = int_to_ptr.vmem [resolvable:$true] %s215_s4 }
  0x2f   : > { %s68_s15 = sadd.s32 %s67_s7, %s1367_s14  ;;  %s1345_s3 = sadd.s32 1, %s981_s17 }
  0x30   : > { %s69_s25 = ssub.s32 %s66_s9, %s68_s15  ;;  %s202_s13 = scalar_lea.sflag [#allocation3], %s1162_s10 }
  0x31   : > { %s212_s0 = scalar_lea.hbm %s1344_s1, %s639_s11  ;;  %p70_p10 = scmp.eq.s32.totalorder %s69_s25, 0 }
  0x32   : > { %s213_s23 = sshll.u32 %s212_s0, 4  ;;  %s1016_s1 = smov 128   ;;  %s214_s23 = int_to_ptr.hbm [resolvable:$true] %s213_s23 }
  0x33   : > { %s1177_s22 = scalar_select %p126_p9, %s981_s17, %s1345_s3  }
  0x34   : > { %s1180_s30 = scalar_select %p70_p10, %s993_s20, %s72_s27  }
  0x35   : > { %s1017_s21 = smov 8   ;;  %s236_s15 = scalar_lea.hbm %s1312_s2, %s639_s11 }
  0x36   : > { %662 = dma.hbm_to_vmem [thread:$0]  (!%p1149_p7), %s214_s23, 256, %s216_s4, %s202_s13, %s1016_s1, %s1016_s1, %s1017_s21  }
  0x37   : > { %s229_s9 = scalar_lea.vmem [#allocation7], %s613_s29  ;;  %s237_s6 = sshll.u32 %s236_s15, 4  ;;  %s238_s6 = int_to_ptr.hbm [resolvable:$true] %s237_s6 }
  0x38   : > { %s239_s26 = sshll.u32 %s229_s9, 4  ;;  %s226_s25 = scalar_lea.sflag [#allocation8], %s1162_s10  ;;  %s240_s26 = int_to_ptr.vmem [resolvable:$true] %s239_s26 }
  0x39   : > { %665 = dma.hbm_to_vmem [thread:$0]  (!%p1149_p7), %s238_s6, 256, %s240_s26, %s226_s25, %s1016_s1, %s1016_s1, %s1017_s21  }
  0x3a   : > { %251 = sbr.rel (%p1135_p0) target bundleno = 151 (0x97), region = 32 }
  0x3f   : > { %952 = dma.done.wait (%p1106_p3), [#allocation5], 16  }
  0x40   : > { %954 = vsyncadd (%p1106_p3), [#allocation5], 4294967280  ;;  %s258_s3 = sand.u32 1, %s989_s19  }
  0x41   : > { %s621_s4 = sshll.u32 %s258_s3, 4  ;;  %s259_s23 = scalar_lea.sflag [#allocation3], %s258_s3 }
  0x42   : > { %s262_s27 = scalar_lea.vmem [#allocation6], %s621_s4 }
  0x43   : > { %956 = dma.done.wait (%p1117_p5), %s259_s23, 256  }
  0x44   : > { %958 = vsyncadd (%p1117_p5), %s259_s23, 4294967040  ;;  %s269_s1 = scalar_lea.sflag [#allocation8], %s258_s3  ;;  %s272_s21 = scalar_lea.vmem [#allocation7], %s621_s4 }
  0x45   : > { %960 = dma.done.wait (%p1117_p5), %s269_s1, 256  }
  0x46   : > { %962 = vsyncadd (%p1117_p5), %s269_s1, 4294967040 }
  0x47   : > { %278 = sfence }
  0x48   : > { %s1207_s28 = sand.u32 1, %s977_s16   ;;  %s1346_s29 = sld [smem:[#allocation18_spill]] }
  0x49   : > { %s623_s8 = sshll.u32 %s1207_s28, 4 }
  0x4a   : > { %s1210_s12 = scalar_lea.vmem [#allocation9], %s623_s8  ;;  %s1212_s10 = scalar_lea.vmem [#allocation10], %s623_s8 }
  0x4e   : > { %p625_p3 = scmp.ne.s32.totalorder %s1346_s29, 0 }
  0x50   : > { %320 = sbr.rel (%p625_p3) target bundleno = 90 (0x5a), region = 48 }
  0x55   : > { %v1018_v0 = vmov 0.0  }
  0x56   : > { %321 = vst [vmem:[%s1210_s12] sm:$0xff] %v1018_v0 }
  0x57   : > { %322 = vst [vmem:[%s1210_s12 + $0x8] sm:$0xff] %v1018_v0 }
  0x58   : > { %323 = vst [vmem:[%s1212_s10] sm:$0xff] %v1018_v0 }
  0x59   : > { %324 = vst [vmem:[%s1212_s10 + $0x8] sm:$0xff] %v1018_v0 }
  0x5a PF: > { %s325_s5 = sld [smem:[#allocation2]]  ;;  %v328_v1 = vld [vmem:[%s262_s27] sm:$0xff]  ;;  %v329_v2 = vld [vmem:[%s262_s27 + $0x8] sm:$0xff]  ;;  %v377_v21 = vlaneseq  ;;  %s432_s27 = sshll.u32 %s1210_s12, 4  ;;  %s1236_s27 = int_to_ptr.vmem [resolvable:$true] %s432_s27 }
  0x5b   : > { %s626_s11 = sld [smem:[#allocation2 + $0x1]]  ;;  %v335_v3 = vld [vmem:[%s272_s21] sm:$0xff]  ;;  %v336_v4 = vld [vmem:[%s272_s21 + $0x8] sm:$0xff]  ;;  %v330_v5 = vmul.f32 12.0, %v328_v1  ;;  %v331_v6 = vmul.f32 12.0, %v329_v2  ;;  %v1019_v1 = vmov 0.0  }
  0x5c   : > { %v337_v7 = vmul.f32 7.5, %v335_v3  ;;  %s1347_s13 = sld [smem:[#allocation19_spill]]  ;;  %v338_v8 = vmul.f32 7.5, %v336_v4  ;;  %v378_v22 = vshrl.u32 %v377_v21, 7  ;;  %v381_v36 = vand.u32 127, %v377_v21 }
  0x5d   : > { %s1348_s0 = sld [smem:[#allocation18_spill]]  ;;  %v396_v56 = vld [vmem:[%s1210_s12] sm:$0xff] }
  0x5e   : > { %v379_v26 = vadd.s32 8, %v378_v22  ;;  %s1221_s26 = sld [smem:[#allocation2 + $0x2]]  ;;  %v385_v29 = vmul.u32 128, %v378_v22  ;;  %v397_v58 = vld [vmem:[%s1210_s12 + $0x8] sm:$0xff] }
  0x5f   : > { %s1349_s4 = sld [smem:[#allocation26_spill]]  ;;  %v402_v60 = vld [vmem:[%s1212_s10] sm:$0xff] }
  0x60   : > { %v332_v9 = vstv %s325_s5  ;;  %v386_v33 = vmul.u32 128, %v379_v26  ;;  %s1350_s8 = sld [smem:[#allocation27_spill]]  ;;  %v403_v63 = vld [vmem:[%s1212_s10 + $0x8] sm:$0xff] }
  0x61   : > { %v333_v10 = vsub.f32 %v330_v5, %v332_v9  ;;  %v339_v11 = vstv %s626_s11  ;;  %v334_v12 = vsub.f32 %v331_v6, %v332_v9  ;;  %s449_s11 = sshll.u32 %s1212_s10, 4  ;;  %s1242_s11 = int_to_ptr.vmem [resolvable:$true] %s449_s11 }
  0x62   : > { %v340_v13 = vsub.f32 %v337_v7, %v339_v11  ;;  %v341_v14 = vsub.f32 %v338_v8, %v339_v11  ;;  %s382_s7 = smul.u32 3, %s1347_s13  ;;  %s641_s6 = sshll.u32 %s1347_s13, 4 }
  0x63   : > { %v342_v15 = vmul.f32 %v333_v10, %v333_v10  ;;  %v343_v16 = vmul.f32 %v334_v12, %v334_v12 }
  0x64   : > { %v344_v17 = vmul.f32 %v340_v13, %v340_v13  ;;  %v345_v18 = vmul.f32 %v341_v14, %v341_v14  ;;  %s383_s15 = sadd.s32 %s1348_s0, %s382_s7  ;;  %v372_v45 = vstv %s1221_s26  ;;  %s415_s7 = scalar_lea.sflag [#allocation4], %s1207_s28 }
  0x65   : > { %s628_s9 = sshll.u32 %s383_s15, 11  ;;  %s431_s23 = scalar_lea.hbm %s1349_s4, %s641_s6 }
  0x66   : > { %v346_v19 = vadd.f32 %v344_v17, %v342_v15  ;;  %v347_v20 = vadd.f32 %v345_v18, %v343_v16  ;;  %v387_v32 = vstv %s628_s9  ;;  %s448_s29 = scalar_lea.hbm %s1350_s8, %s641_s6  ;;  %s434_s5 = sshll.u32 %s431_s23, 4  ;;  %s435_s5 = int_to_ptr.hbm [resolvable:$true] %s434_s5 }
  0x67   : > { %v388_v37 = vadd.s32 %v387_v32, %v385_v29  ;;  %v389_v40 = vadd.s32 %v387_v32, %v386_v33  ;;  %s451_s13 = sshll.u32 %s448_s29, 4  ;;  %s865_s15 = sshra.s32 %s435_s5, 4  ;;  %s1244_s13 = int_to_ptr.hbm [resolvable:$true] %s451_s13  ;;  %s866_s15 = int_to_ptr.hbm [resolvable:$true] %s865_s15 }
  0x68   : > { %772 = vrsqrt.f32 %v346_v19  ;;  %vm355_vm0 = vcmp.eq.f32.partialorder %v346_v19, inf  ;;  %v358_v41 = vand.u32 2147483648, %v346_v19  ;;  %vm357_vm1 = vcmp.eq.f32.partialorder %v346_v19, 0.0  ;;  %s867_s9 = scalar_lea.hbm %s866_s15, 16  ;;  %s871_s25 = scalar_lea.hbm %s1349_s4, 32 }
  0x69   : > { %774 = vrsqrt.f32 %v347_v20  ;;  %vm367_vm2 = vcmp.eq.f32.partialorder %v347_v20, inf  ;;  %v370_v44 = vand.u32 2147483648, %v347_v20  ;;  %v390_v46 = vadd.s32 %v388_v37, %v381_v36  ;;  %p868_p5 = scmp.ne.s32.totalorder %s866_s15, %s867_s9  ;;  %p872_p1 = scmp.lt.s32.totalorder %s866_s15, %s1349_s4 }
  0x6a   : > { %vm369_vm3 = vcmp.eq.f32.partialorder %v347_v20, 0.0  ;;  %v391_v49 = vadd.s32 %v389_v40, %v381_v36  ;;  %p873_p2 = scmp.lt.s32.totalorder %s871_s25, %s867_s9 }
  0x6b   : > { %vm392_vm4 = vcmp.lt.s32.totalorder %v390_v46, 10000  ;;  %p869_p12 = pnand %p868_p5, %p1126_p11 }
  0x6c   : > { %vm393_vm5 = vcmp.lt.s32.totalorder %v391_v49, 10000  ;;  %p874_p6 = por %p873_p2, %p872_p1 }
  0x6d   : > { %p870_p0 = pneg %p869_p12 }
  0x6e   : > { %v773_v23 = vpop.eup %772 }
  0x6f   : > { %v775_v24 = vpop.eup %774  ;;  %v349_v25 = vmul.f32 %v773_v23, %v346_v19  ;;  %p875_p7 = pnand %p874_p6, %p870_p0 }
  0x70   : > { %v361_v27 = vmul.f32 %v775_v24, %v347_v20 }
  0x71   : > { %v350_v28 = vmul.f32 %v773_v23, %v349_v25 }
  0x72   : > { %v362_v30 = vmul.f32 %v775_v24, %v361_v27 }
  0x73   : > { %v351_v31 = vmul.f32 0.5, %v350_v28 }
  0x74   : > { %v363_v34 = vmul.f32 0.5, %v362_v30 }
  0x75   : > { %v352_v35 = vsub.f32 1.5, %v351_v31 }
  0x76   : > { %v364_v38 = vsub.f32 1.5, %v363_v34 }
  0x77   : > { %v353_v39 = vmul.f32 %v773_v23, %v352_v35 }
  0x78   : > { %v365_v42 = vmul.f32 %v775_v24, %v364_v38 }
  0x79   : > { %v354_v43 = vmul.f32 %v353_v39, %v346_v19 }
  0x7a   : > { %v366_v47 = vmul.f32 %v365_v42, %v347_v20 }
  0x7b   : > { %v356_v48 = vsel %vm355_vm0, %v346_v19, %v354_v43 }
  0x7c   : > { %v359_v50 = vsel %vm357_vm1, %v358_v41, %v356_v48  ;;  %v368_v51 = vsel %vm367_vm2, %v347_v20, %v366_v47 }
  0x7d   : > { %v373_v52 = vsub.f32 %v372_v45, %v359_v50  ;;  %v371_v53 = vsel %vm369_vm3, %v370_v44, %v368_v51 }
  0x7e   : > { %v374_v54 = vsub.f32 %v372_v45, %v371_v53 }
  0x7f   : > { %v375_v55 = vmax.f32 %v373_v52, 0.0 }
  0x80   : > { %v376_v57 = vmax.f32 %v374_v54, 0.0 }
  0x81   : > { %v394_v59 = vsel %vm392_vm4, %v375_v55, 0.0 }
  0x82   : > { %v398_v61 = vadd.f32 %v396_v56, %v394_v59  ;;  %v395_v62 = vsel %vm393_vm5, %v376_v57, 0.0  ;;  %vm404_vm6 = vcmp.gt.f32.partialorder %v394_v59, 0.0 }
  0x83   : > { %v399_v0 = vadd.f32 %v397_v58, %v395_v62  ;;  %v629_v2 = vsel %vm404_vm6, 1.0, %v1019_v1  ;;  %vm405_vm7 = vcmp.gt.f32.partialorder %v395_v62, 0.0 }
  0x84   : > { %400 = vst [vmem:[%s1210_s12] sm:$0xff] %v398_v61  ;;  %v410_v3 = vadd.f32 %v629_v2, %v402_v60  ;;  %v630_v4 = vsel %vm405_vm7, 1.0, %v1019_v1 }
  0x85   : > { %401 = vst [vmem:[%s1210_s12 + $0x8] sm:$0xff] %v399_v0  ;;  %v411_v5 = vadd.f32 %v630_v4, %v403_v63 }
  0x86   : > { %412 = vst [vmem:[%s1212_s10] sm:$0xff] %v410_v3 }
  0x87   : > { %413 = vst [vmem:[%s1212_s10 + $0x8] sm:$0xff] %v411_v5 }
  0x88   : > { %878 = shalt.err (!%p875_p7)
}
  0x89   : > { %s1020_s10 = smov 128   ;;  %s1021_s23 = smov 8  }
  0x8a   : > { %651 = dma.vmem_to_hbm [thread:$0]  (%p1126_p11), %s1236_s27, 256, %s435_s5, %s415_s7, %s1020_s10, %s1020_s10, %s1021_s23  }
  0x8b   : > { %s420_s1 = scalar_lea.sflag [#allocation11], %s1207_s28  ;;  %s893_s21 = sshra.s32 %s1244_s13, 4  ;;  %s894_s21 = int_to_ptr.hbm [resolvable:$true] %s893_s21 }
  0x8c   : > { %s895_s29 = scalar_lea.hbm %s894_s21, 16  ;;  %s899_s26 = scalar_lea.hbm %s1350_s8, 32 }
  0x8d   : > { %p896_p8 = scmp.ne.s32.totalorder %s894_s21, %s895_s29  ;;  %p900_p10 = scmp.lt.s32.totalorder %s894_s21, %s1350_s8 }
  0x8e   : > { %p901_p3 = scmp.lt.s32.totalorder %s899_s26, %s895_s29 }
  0x8f   : > { %p897_p4 = pnand %p896_p8, %p1126_p11 }
  0x90   : > { %p902_p5 = por %p901_p3, %p900_p10 }
  0x91   : > { %p898_p9 = pneg %p897_p4 }
  0x93   : > { %p903_p12 = pnand %p902_p5, %p898_p9 }
  0x95   : > { %906 = shalt.err (!%p903_p12)
}
  0x96   : > { %652 = dma.vmem_to_hbm [thread:$0]  (%p1126_p11), %s1242_s11, 256, %s1244_s13, %s420_s1, %s1020_s10, %s1020_s10, %s1021_s23  }
  0x97 PF: > { %s1352_s28 = sld [smem:[#allocation21_spill]] }
  0x98   : > { %s1353_s27 = sld [smem:[#allocation17_spill]] }
  0x9d   : > { %p676_p0 = scmp.ge.s32.totalorder %s1352_s28, 2 }
  0x9e   : > { %s466_s7 = sand.u32 1, %s1353_s27  }
  0x9f   : > { %p667_p1 = pnand %p676_p0, %p1131_p13  ;;  %s467_s12 = scalar_lea.sflag [#allocation4], %s466_s7 }
  0xa1   : > { %p668_p2 = pneg %p667_p1 }
  0xa3   : > { %964 = dma.done.wait (%p668_p2), %s467_s12, 256  }
  0xa4   : > { %966 = vsyncadd (%p668_p2), %s467_s12, 4294967040  ;;  %s477_s3 = scalar_lea.sflag [#allocation11], %s466_s7 }
  0xa5   : > { %968 = dma.done.wait (%p668_p2), %s477_s3, 256  }
  0xa6   : > { %970 = vsyncadd (%p668_p2), %s477_s3, 4294967040  ;;  %s28_s25 = sadd.s32 1, %s1352_s28   ;;  %s1355_s21 = sld [smem:[#allocation20_spill]] }
  0xa7   : > { %p25_p6 = scmp.ge.s32.totalorder %s28_s25, 8   ;;  %s1356_s11 = smov %s1371_s18 }
  0xa8   : > { %s1357_s15 = smov %s977_s16  ;;  %s1358_s16 = smov %s981_s17 }
  0xa9   : > { %s1359_s17 = smov %s1177_s22  ;;  %s1360_s18 = smov %s989_s19 }
  0xaa   : > { %s1361_s19 = smov %s993_s20  ;;  %s1362_s20 = smov %s1180_s30 }
  0xab   : > { %s1363_s22 = smov %s1009_s24  ;;  %s1364_s23 = smov %s1367_s14 }
  0xac   : > { %s1365_s24 = smov %s1356_s11  ;;  %27 = sbr.rel (!%p25_p6) target bundleno = 19 (0x13), region = 116 }
  0xb1   :  { %483 = vsyncpa [#allocation3], 1 }
  0xb2   :  { %485 = vsyncpa [#allocation3 + $0x1], 1 }
  0xb3   :  { %486 = vsyncpa [#allocation8], 1 }
  0xb4   :  { %488 = vsyncpa [#allocation8 + $0x1], 1 }
  0xb5   :  { %489 = vsyncpa [#allocation4], 1 }
  0xb6   :  { %491 = vsyncpa [#allocation4 + $0x1], 1 }
  0xb7   :  { %492 = vsyncpa [#allocation11], 1 }
  0xb8   :  { %494 = vsyncpa [#allocation11 + $0x1], 1 }
  0xb9   :  { %495 = vsyncpa [#allocation5], 1 }
  0xba   :  { %497 = vsyncpa [#allocation5 + $0x1], 1 }

</bundles_post_ra>
